<compile_context>
chip_gen: v7x
topology: tpu7x:2x2x1
jax: 0.10.0
libtpu: 0.0.40
codegen_flags: <defaults>
</compile_context>

<pallas_src>
import math
from functools import partial

import numpy as np
import jax
import jax.numpy as jnp
from jax import lax
from jax.experimental import pallas as pl
from jax.experimental.pallas import tpu as pltpu


def creat_real_dictionary(T, rr, theta):
    """Plain-JAX glue: builds the (T, 1 + 2N) DYAN dictionary."""
    i = jnp.arange(T, dtype=jnp.float32)[:, None]          # (T, 1)
    pow_r = jnp.power(rr[None, :], i)                      # (T, N)
    w1 = pow_r * jnp.cos(i * theta[None, :])               # (T, N)
    w2 = pow_r * jnp.sin(i * theta[None, :])               # (T, N)
    ones = jnp.ones((T, 1), dtype=jnp.float32)
    return jnp.concatenate([ones, w1, w2], axis=1)         # (T, K)


def _lipschitz_psd(M, n_square=8, n_power=4):
    """Dominant eigenvalue of a small symmetric PSD matrix without an
    eigensolver launch: repeated squaring + power iteration + Rayleigh
    quotient (plain JAX, runs fused under jit)."""
    eps = jnp.float32(1e-30)

    def _nrm_mat(P):
        return P / jnp.maximum(jnp.max(jnp.abs(P)), eps)

    def _nrm_vec(v):
        return v / jnp.maximum(jnp.linalg.norm(v), eps)

    P = _nrm_mat(M)
    P = lax.fori_loop(0, n_square, lambda _, P: _nrm_mat(P @ P), P)
    v = _nrm_vec(P @ jnp.ones((M.shape[0],), M.dtype))
    v = lax.fori_loop(0, n_power, lambda _, v: _nrm_vec(M @ v), v)
    return jnp.dot(v, M @ v)


def _dyan_kernel(laml_ref, tt_ref, a_ref, d_ref, dtl_ref, x_ref,
                 code_ref, rec_ref, *, K, F, max_iter):
    """Flattened, lane-major layout: columns = b*F + f samples.

    Inputs : lam/L (1,1) SMEM, tt schedule (1,max_iter) SMEM,
             A (K,K), D (T,K), D^T/L (K,T), x (T, B*F) in VMEM.
    Outputs: code (K, B*F), rec (T, B*F) in VMEM.
    """
    lamL = laml_ref[0, 0]                     # lam / L
    A = a_ref[...]                            # (K, K) = I - DtD / L  (symmetric)
    D = d_ref[...]                            # (T, K)
    DtL = dtl_ref[...]                        # (K, T) = D^T / L
    x = x_ref[...]                            # (T, B*F)

    # DtY_L[k, bf] = (1/L) * sum_t D[t, k] * x[b, t, f]
    DtY_L = jnp.dot(DtL, x, preferred_element_type=jnp.float32)   # (K, BF)

    # Sqrt-free convergence thresholds.  torch divides the 2-norm by
    # x_old.shape[1]: F on the first iteration (unbatched (K,F) zero init)
    # and K afterwards (x_old becomes (B,K,F)).
    thr_first = jnp.float32((1e-5 * F) ** 2)
    thr_rest = jnp.float32((1e-5 * K) ** 2)
    zeros = jnp.zeros_like(DtY_L)

    def fista(wl):
        # wl = w * lam / L, scalar (first solve) or (K, BF) (second solve).

        def cond_fn(carry):
            it, done, _, _, _ = carry
            return jnp.logical_and(it < max_iter, done == 0)

        def body_fn(carry):
            it, _, thr, x_old, y_old = carry
            Ay = jnp.dot(A, y_old, preferred_element_type=jnp.float32)
            z = Ay + DtY_L
            # soft threshold formed in place (== max(0, z-wl) + min(0, z+wl))
            x_new = jnp.maximum(0.0, z - wl) + jnp.minimum(0.0, z + wl)
            tt = tt_ref[0, it]                 # precomputed (t_old - 1) / t_new
            y_new = x_new + tt * (x_new - x_old)
            diff = x_old - x_new
            # lane reduce, then sublane reduce
            sq = jnp.sum(jnp.sum(diff * diff, axis=-1, keepdims=True))
            conv = (sq < thr).astype(jnp.int32)
            # torch sets x_old = x_new before breaking, so always carrying
            # x_new (and exiting on `conv`) reproduces the reference exactly.
            return it + 1, conv, thr_rest, x_new, y_new

        carry0 = (jnp.int32(0), jnp.int32(0), thr_first, zeros, zeros)
        _, _, _, x_final, _ = lax.while_loop(cond_fn, body_fn, carry0)
        return x_final

    # Outer reweighting loop (runs exactly twice, as in the torch module).
    code = fista(lamL)                                   # w == 1
    w = 1.0 / (jnp.abs(code) + 0.01)
    w = w * lax.rsqrt(jnp.sum(w * w))                    # w / ||w||_F (batch-global)
    code = fista(w * (jnp.float32(K) * lamL))

    code_ref[...] = code
    # reconst[b,t,f] = sum_k D[t,k] * code[b,k,f]  ->  rec = D @ code
    rec_ref[...] = jnp.dot(D, code, preferred_element_type=jnp.float32)


@partial(jax.jit, static_argnames=("max_iter",))
def dyan_encoder_forward(x, rr, theta, lam, max_iter=100):
    B, T, F = x.shape
    x = x.astype(jnp.float32)
    dic = creat_real_dictionary(T, rr, theta).astype(jnp.float32)   # (T, K)
    K = dic.shape[1]

    # TODO(synk): torch uses torch.linalg.eigvals (general eig, on CPU); DtD
    # is symmetric PSD, so its dominant eigenvalue is computed here with
    # repeated squaring + power iteration instead of an eigensolver launch.
    DtD = dic.T @ dic
    L = _lipschitz_psd(DtD)
    linv = (1.0 / L).astype(jnp.float32)

    A = jnp.eye(K, dtype=jnp.float32) - DtD * linv                  # (K, K)
    dt_l = dic.T * linv                                             # (K, T) = D^T / L
    lam_linv = jnp.reshape(jnp.asarray(lam, jnp.float32) * linv, (1, 1))

    # Data-independent FISTA momentum schedule tt_k = (t_{k-1} - 1) / t_k.
    tt_np = np.zeros((max_iter,), np.float32)
    t_old = 1.0
    for k in range(int(max_iter)):
        t_new = (1.0 + math.sqrt(1.0 + 4.0 * t_old * t_old)) / 2.0
        tt_np[k] = (t_old - 1.0) / t_new
        t_old = t_new
    tt = jnp.asarray(tt_np).reshape(1, max_iter)

    # Flatten the batch onto lanes: column index = b*F + f.
    x_t = jnp.transpose(x, (1, 0, 2)).reshape(T, B * F)             # (T, BF)

    kernel = partial(_dyan_kernel, K=K, F=F, max_iter=int(max_iter))
    code_t, rec_t = pl.pallas_call(
        kernel,
        out_shape=(jax.ShapeDtypeStruct((K, B * F), jnp.float32),
                   jax.ShapeDtypeStruct((T, B * F), jnp.float32)),
        in_specs=[
            pl.BlockSpec(memory_space=pltpu.MemorySpace.SMEM),   # lam / L scalar
            pl.BlockSpec(memory_space=pltpu.MemorySpace.SMEM),   # tt schedule
            pl.BlockSpec(memory_space=pltpu.MemorySpace.VMEM),   # A = I - DtD/L
            pl.BlockSpec(memory_space=pltpu.MemorySpace.VMEM),   # D   (T, K)
            pl.BlockSpec(memory_space=pltpu.MemorySpace.VMEM),   # D^T/L (K, T)
            pl.BlockSpec(memory_space=pltpu.MemorySpace.VMEM),   # x   (T, BF)
        ],
        out_specs=(pl.BlockSpec(memory_space=pltpu.MemorySpace.VMEM),
                   pl.BlockSpec(memory_space=pltpu.MemorySpace.VMEM)),
    )(lam_linv, tt, A, dic, dt_l, x_t)

    sparse_code = code_t.reshape(K, B, F).transpose(1, 0, 2)   # (B, K, F)
    reconst = rec_t.reshape(T, B, F).transpose(1, 0, 2)        # (B, T, F)
    return sparse_code, dic, reconst


if __name__ == "__main__":
    key = jax.random.PRNGKey(0)
    k1, k2, k3 = jax.random.split(key, 3)

    N = 16                 # pole pairs -> dictionary width K = 1 + 2N = 33
    B, T, F = 2, 8, 16     # batch, temporal window, feature columns
    lam = 0.1

    rr = jax.random.uniform(k1, (N,), jnp.float32, 0.85, 0.99)
    theta = jax.random.uniform(k2, (N,), jnp.float32, 0.0, math.pi)
    x = jax.random.normal(k3, (B, T, F), dtype=jnp.float32)

    sparse_code, dic, reconst = dyan_encoder_forward(x, rr, theta, lam)
    jax.block_until_ready((sparse_code, dic, reconst))

    assert sparse_code.shape == (B, 1 + 2 * N, F)
    assert dic.shape == (T, 1 + 2 * N)
    assert reconst.shape == (B, T, F)
    assert bool(jnp.all(jnp.isfinite(sparse_code)))
    assert bool(jnp.all(jnp.isfinite(reconst)))
    print("KERNEL_OK")
</pallas_src>

<mosaic_0001>
module attributes {stable_mosaic.version = 11 : i64} {
  func.func @_dyan_kernel(%arg0: memref<1x1xf32, #tpu.memory_space<smem>>, %arg1: memref<1x100xf32, #tpu.memory_space<smem>>, %arg2: memref<33x33xf32, #tpu.memory_space<vmem>>, %arg3: memref<8x33xf32, #tpu.memory_space<vmem>>, %arg4: memref<33x8xf32, #tpu.memory_space<vmem>>, %arg5: memref<8x32xf32, #tpu.memory_space<vmem>>, %arg6: memref<33x32xf32, #tpu.memory_space<vmem>>, %arg7: memref<8x32xf32, #tpu.memory_space<vmem>>) attributes {dimension_semantics = [], scalar_prefetch = 0 : i64, scratch_operands = 0 : i64, tpu.core_type = #tpu.core_type<tc>} {
    %c0 = arith.constant 0 : index
    %c0_0 = arith.constant 0 : index
    %0 = memref.load %arg0[%c0, %c0_0] : memref<1x1xf32, #tpu.memory_space<smem>>
    %c0_1 = arith.constant 0 : index
    %c0_2 = arith.constant 0 : index
    %1 = vector.load %arg2[%c0_1, %c0_2] : memref<33x33xf32, #tpu.memory_space<vmem>>, vector<33x33xf32>
    %c0_3 = arith.constant 0 : index
    %c0_4 = arith.constant 0 : index
    %2 = vector.load %arg3[%c0_3, %c0_4] : memref<8x33xf32, #tpu.memory_space<vmem>>, vector<8x33xf32>
    %c0_5 = arith.constant 0 : index
    %c0_6 = arith.constant 0 : index
    %3 = vector.load %arg4[%c0_5, %c0_6] : memref<33x8xf32, #tpu.memory_space<vmem>>, vector<33x8xf32>
    %c0_7 = arith.constant 0 : index
    %c0_8 = arith.constant 0 : index
    %4 = vector.load %arg5[%c0_7, %c0_8] : memref<8x32xf32, #tpu.memory_space<vmem>>, vector<8x32xf32>
    %cst = arith.constant dense<0.000000e+00> : vector<33x32xf32>
    %5 = tpu.matmul %3, %4, %cst {dimension_numbers = #tpu.dot_dimension_numbers<[1], [0], [0], [1], [0, 0, 1, 1], [], []>} : vector<33x8xf32>, vector<8x32xf32>, vector<33x32xf32> -> vector<33x32xf32>
    %cst_9 = arith.constant 0.000000e+00 : f32
    %6 = vector.broadcast %cst_9 : f32 to vector<33x32xf32>
    %cst_10 = arith.constant 1.089000e-07 : f32
    %c0_i32 = arith.constant 0 : i32
    %c0_i32_11 = arith.constant 0 : i32
    %cst_12 = arith.constant 2.560000e-08 : f32
    %7:5 = scf.while (%arg8 = %c0_i32, %arg9 = %c0_i32_11, %arg10 = %cst_12, %arg11 = %6, %arg12 = %6) : (i32, i32, f32, vector<33x32xf32>, vector<33x32xf32>) -> (i32, i32, f32, vector<33x32xf32>, vector<33x32xf32>) {
      %c100_i32 = arith.constant 100 : i32
      %28 = arith.cmpi slt, %arg8, %c100_i32 : i32
      %c0_i32_26 = arith.constant 0 : i32
      %29 = arith.cmpi eq, %arg9, %c0_i32_26 : i32
      %30 = arith.andi %28, %29 : i1
      scf.condition(%30) %arg8, %arg9, %arg10, %arg11, %arg12 : i32, i32, f32, vector<33x32xf32>, vector<33x32xf32>
    } do {
    ^bb0(%arg8: i32, %arg9: i32, %arg10: f32, %arg11: vector<33x32xf32>, %arg12: vector<33x32xf32>):
      %cst_26 = arith.constant dense<0.000000e+00> : vector<33x32xf32>
      %28 = tpu.matmul %1, %arg12, %cst_26 {dimension_numbers = #tpu.dot_dimension_numbers<[1], [0], [0], [1], [0, 0, 1, 1], [], []>} : vector<33x33xf32>, vector<33x32xf32>, vector<33x32xf32> -> vector<33x32xf32>
      %29 = arith.addf %28, %5 : vector<33x32xf32>
      %30 = vector.broadcast %0 : f32 to vector<33x32xf32>
      %31 = arith.subf %29, %30 : vector<33x32xf32>
      %cst_27 = arith.constant 0.000000e+00 : f32
      %32 = vector.broadcast %cst_27 : f32 to vector<33x32xf32>
      %33 = arith.maximumf %32, %31 : vector<33x32xf32>
      %34 = vector.broadcast %0 : f32 to vector<33x32xf32>
      %35 = arith.addf %29, %34 : vector<33x32xf32>
      %cst_28 = arith.constant 0.000000e+00 : f32
      %36 = vector.broadcast %cst_28 : f32 to vector<33x32xf32>
      %37 = arith.minimumf %36, %35 : vector<33x32xf32>
      %38 = arith.addf %33, %37 : vector<33x32xf32>
      %c0_29 = arith.constant 0 : index
      %39 = arith.index_cast %arg8 : i32 to index
      %40 = memref.load %arg1[%c0_29, %39] : memref<1x100xf32, #tpu.memory_space<smem>>
      %41 = arith.subf %38, %arg11 : vector<33x32xf32>
      %42 = vector.broadcast %40 : f32 to vector<33x32xf32>
      %43 = arith.mulf %42, %41 : vector<33x32xf32>
      %44 = arith.addf %38, %43 : vector<33x32xf32>
      %45 = arith.subf %arg11, %38 : vector<33x32xf32>
      %46 = arith.mulf %45, %45 : vector<33x32xf32>
      %cst_30 = arith.constant dense<0.000000e+00> : vector<33xf32>
      %47 = vector.multi_reduction <add>, %46, %cst_30 [1] : vector<33x32xf32> to vector<33xf32>
      %48 = vector.shape_cast %47 : vector<33xf32> to vector<33x1xf32>
      %49 = vector.shape_cast %48 : vector<33x1xf32> to vector<1x33x1xf32>
      %cst_31 = arith.constant dense<0.000000e+00> : vector<1xf32>
      %50 = vector.multi_reduction <add>, %49, %cst_31 [1, 2] : vector<1x33x1xf32> to vector<1xf32>
      %51 = vector.shape_cast %50 : vector<1xf32> to vector<1x1x1xf32>
      %52 = vector.extract %51[0, 0, 0] : f32 from vector<1x1x1xf32>
      %53 = arith.cmpf olt, %52, %arg10 : f32
      %54 = arith.extui %53 : i1 to i32
      %c1_i32 = arith.constant 1 : i32
      %55 = arith.addi %arg8, %c1_i32 : i32
      scf.yield %55, %54, %cst_10, %38, %44 : i32, i32, f32, vector<33x32xf32>, vector<33x32xf32>
    }
    %8 = math.absf %7#3 : vector<33x32xf32>
    %cst_13 = arith.constant 0.00999999977 : f32
    %9 = vector.broadcast %cst_13 : f32 to vector<33x32xf32>
    %10 = arith.addf %8, %9 : vector<33x32xf32>
    %cst_14 = arith.constant 1.000000e+00 : f32
    %11 = vector.broadcast %cst_14 : f32 to vector<33x32xf32>
    %12 = arith.divf %11, %10 : vector<33x32xf32>
    %13 = arith.mulf %12, %12 : vector<33x32xf32>
    %14 = vector.shape_cast %13 : vector<33x32xf32> to vector<1x33x32xf32>
    %cst_15 = arith.constant dense<0.000000e+00> : vector<1xf32>
    %15 = vector.multi_reduction <add>, %14, %cst_15 [1, 2] : vector<1x33x32xf32> to vector<1xf32>
    %16 = vector.shape_cast %15 : vector<1xf32> to vector<1x1x1xf32>
    %17 = vector.extract %16[0, 0, 0] : f32 from vector<1x1x1xf32>
    %18 = math.rsqrt %17 : f32
    %19 = vector.broadcast %18 : f32 to vector<33x32xf32>
    %20 = arith.mulf %12, %19 : vector<33x32xf32>
    %cst_16 = arith.constant 3.300000e+01 : f32
    %21 = arith.mulf %cst_16, %0 : f32
    %22 = vector.broadcast %21 : f32 to vector<33x32xf32>
    %23 = arith.mulf %20, %22 : vector<33x32xf32>
    %cst_17 = arith.constant 1.089000e-07 : f32
    %c0_i32_18 = arith.constant 0 : i32
    %c0_i32_19 = arith.constant 0 : i32
    %cst_20 = arith.constant 2.560000e-08 : f32
    %24:5 = scf.while (%arg8 = %c0_i32_18, %arg9 = %c0_i32_19, %arg10 = %cst_20, %arg11 = %6, %arg12 = %6) : (i32, i32, f32, vector<33x32xf32>, vector<33x32xf32>) -> (i32, i32, f32, vector<33x32xf32>, vector<33x32xf32>) {
      %c100_i32 = arith.constant 100 : i32
      %28 = arith.cmpi slt, %arg8, %c100_i32 : i32
      %c0_i32_26 = arith.constant 0 : i32
      %29 = arith.cmpi eq, %arg9, %c0_i32_26 : i32
      %30 = arith.andi %28, %29 : i1
      scf.condition(%30) %arg8, %arg9, %arg10, %arg11, %arg12 : i32, i32, f32, vector<33x32xf32>, vector<33x32xf32>
    } do {
    ^bb0(%arg8: i32, %arg9: i32, %arg10: f32, %arg11: vector<33x32xf32>, %arg12: vector<33x32xf32>):
      %cst_26 = arith.constant dense<0.000000e+00> : vector<33x32xf32>
      %28 = tpu.matmul %1, %arg12, %cst_26 {dimension_numbers = #tpu.dot_dimension_numbers<[1], [0], [0], [1], [0, 0, 1, 1], [], []>} : vector<33x33xf32>, vector<33x32xf32>, vector<33x32xf32> -> vector<33x32xf32>
      %29 = arith.addf %28, %5 : vector<33x32xf32>
      %30 = arith.subf %29, %23 : vector<33x32xf32>
      %cst_27 = arith.constant 0.000000e+00 : f32
      %31 = vector.broadcast %cst_27 : f32 to vector<33x32xf32>
      %32 = arith.maximumf %31, %30 : vector<33x32xf32>
      %33 = arith.addf %29, %23 : vector<33x32xf32>
      %cst_28 = arith.constant 0.000000e+00 : f32
      %34 = vector.broadcast %cst_28 : f32 to vector<33x32xf32>
      %35 = arith.minimumf %34, %33 : vector<33x32xf32>
      %36 = arith.addf %32, %35 : vector<33x32xf32>
      %c0_29 = arith.constant 0 : index
      %37 = arith.index_cast %arg8 : i32 to index
      %38 = memref.load %arg1[%c0_29, %37] : memref<1x100xf32, #tpu.memory_space<smem>>
      %39 = arith.subf %36, %arg11 : vector<33x32xf32>
      %40 = vector.broadcast %38 : f32 to vector<33x32xf32>
      %41 = arith.mulf %40, %39 : vector<33x32xf32>
      %42 = arith.addf %36, %41 : vector<33x32xf32>
      %43 = arith.subf %arg11, %36 : vector<33x32xf32>
      %44 = arith.mulf %43, %43 : vector<33x32xf32>
      %cst_30 = arith.constant dense<0.000000e+00> : vector<33xf32>
      %45 = vector.multi_reduction <add>, %44, %cst_30 [1] : vector<33x32xf32> to vector<33xf32>
      %46 = vector.shape_cast %45 : vector<33xf32> to vector<33x1xf32>
      %47 = vector.shape_cast %46 : vector<33x1xf32> to vector<1x33x1xf32>
      %cst_31 = arith.constant dense<0.000000e+00> : vector<1xf32>
      %48 = vector.multi_reduction <add>, %47, %cst_31 [1, 2] : vector<1x33x1xf32> to vector<1xf32>
      %49 = vector.shape_cast %48 : vector<1xf32> to vector<1x1x1xf32>
      %50 = vector.extract %49[0, 0, 0] : f32 from vector<1x1x1xf32>
      %51 = arith.cmpf olt, %50, %arg10 : f32
      %52 = arith.extui %51 : i1 to i32
      %c1_i32 = arith.constant 1 : i32
      %53 = arith.addi %arg8, %c1_i32 : i32
      scf.yield %53, %52, %cst_17, %36, %42 : i32, i32, f32, vector<33x32xf32>, vector<33x32xf32>
    }
    %c0_21 = arith.constant 0 : index
    %c0_22 = arith.constant 0 : index
    %25 = vector.load %arg6[%c0_21, %c0_22] : memref<33x32xf32, #tpu.memory_space<vmem>>, vector<33x32xf32>
    tpu.vector_store %arg6[%c0_21, %c0_22], %24#3 {strides = array<i32>} : memref<33x32xf32, #tpu.memory_space<vmem>>, vector<33x32xf32>,
    %cst_23 = arith.constant dense<0.000000e+00> : vector<8x32xf32>
    %26 = tpu.matmul %2, %24#3, %cst_23 {dimension_numbers = #tpu.dot_dimension_numbers<[1], [0], [0], [1], [0, 0, 1, 1], [], []>} : vector<8x33xf32>, vector<33x32xf32>, vector<8x32xf32> -> vector<8x32xf32>
    %c0_24 = arith.constant 0 : index
    %c0_25 = arith.constant 0 : index
    %27 = vector.load %arg7[%c0_24, %c0_25] : memref<8x32xf32, #tpu.memory_space<vmem>>, vector<8x32xf32>
    tpu.vector_store %arg7[%c0_24, %c0_25], %26 {strides = array<i32>} : memref<8x32xf32, #tpu.memory_space<vmem>>, vector<8x32xf32>,
    return
  }
}

</mosaic_0001>

<bundles_post_ra>
// kernel: dyan_encoder_forward.1
= control target key start
LH: loop header
LB: loop body
LE: loop exit
PB: predicated region body
PF: predicated region fallthrough
CT: control target
= control target key end

     0   :  { %14 = vsyncpa [#allocation4], 0  ;;  %s1938_s0 = inlined_call_operand.<no memory space> [shape: f32[1,1], index: 0, kind: input, shape index: {}]   ;;  %s1939_s1 = inlined_call_operand.vmem [shape: f32[1,100], index: 1, kind: input, shape index: {}]   ;;  %s1940_s2 = inlined_call_operand.vmem [shape: f32[33,33], index: 2, kind: input, shape index: {}]   ;;  %s1941_s3 = inlined_call_operand.vmem [shape: f32[8,33], index: 3, kind: input, shape index: {}]   ;;  %s1942_s4 = inlined_call_operand.vmem [shape: f32[33,8], index: 4, kind: input, shape index: {}]   ;;  %s1943_s5 = inlined_call_operand.vmem [shape: f32[8,32], index: 5, kind: input, shape index: {}]   ;;  %s1944_s6 = inlined_call_operand.vmem [shape: f32[33,32], index: 6, kind: output, shape index: {0}]   ;;  %s1945_s7 = inlined_call_operand.vmem [shape: f32[8,32], index: 7, kind: output, shape index: {1}]  }
   0x1   :  { %s23_s26 = sshll.u32 %s1939_s1, 4  ;;  %s24_s26 = int_to_ptr.vmem [resolvable:$true] %s23_s26 }
   0x2   :  { %s1222_s27 = scalar_lea.vmem %s24_s26, 16  ;;  %p1227_p1 = scmp.lt.s32.totalorder %s24_s26, %s24_s26 }
   0x3   :  { %p1223_p0 = scmp.ne.s32.totalorder %s24_s26, %s1222_s27  ;;  %p1228_p2 = scmp.lt.s32.totalorder %s1222_s27, %s1222_s27 }
   0x5   :  { %p1229_p3 = por %p1228_p2, %p1227_p1 }
   0x7   :  { %p1230_p4 = pnand %p1229_p3, %p1223_p0 }
   0x9   :  { %1233 = shalt.err (!%p1230_p4)
}
   0xa   :  { %s1428_s28 = smov [#allocation3]  }
   0xb   :  { %26 = dma.vmem_to_smem %s24_s26, 16, %s1428_s28, [#allocation4]  }
   0xc   :  { %1330 = dma.done.wait [#allocation4], 16  }
   0xd   :  { %1331 = vsyncadd [#allocation4], 4294967280 }
   0xe   :  { %38 = sfence }
   0xf   :  { %v1484_v0 = vld [vmem:[%s1940_s2] sm:$0xff]  ;;  %v1489_v1 = vld [vmem:[%s1940_s2 + $0x8] sm:$0xff]  ;;  %v1494_v2 = vld [vmem:[%s1940_s2 + $0x10] sm:$0xff]  ;;  %v1429_v6 = vmov 0.0   ;;  %vm1430_vm0 = vmmov 0   ;;  %vm52_vm1 = vcmask 64512  }
  0x10   :  { %v1499_v3 = vld [vmem:[%s1940_s2 + $0x18] sm:$0xff]  ;;  %v1504_v4 = vld [vmem:[%s1940_s2 + $0x20] sm:$0x1]  ;;  %888 = vmatprep.subr.mxu0 %v1429_v6  ;;  %890 = vmatprep.mubr.msk.f32.mxu0 %vm1430_vm0, %v1429_v6  ;;  %v47_v10 = vld [vmem:[%s1942_s4 + $0x8] sm:$0xff]  ;;  %v1556_v23 = vmov 0.0   ;;  %v1558_v24 = vmov 0.0  }
  0x11   :  { %v1509_v5 = vld [vmem:[%s1941_s3] sm:$0xff]  ;;  %986 = vmatprep.subr.mxu1 %v1429_v6  ;;  %899 = vmatprep.mubr.msk.f32.mxu1 %vm1430_vm0, %v1429_v6  ;;  %v49_v9 = vld [vmem:[%s1942_s4 + $0x18] sm:$0xff]  ;;  %v48_v12 = vld [vmem:[%s1942_s4 + $0x10] sm:$0xff]  ;;  %v1560_v25 = vmov 0.0   ;;  %v1562_v26 = vmov 0.0   ;;  %v1564_v27 = vmov 0.0  }
  0x12   :  { %v51_v7 = vld [vmem:[%s1943_s5] sm:$0xff]  ;;  %v1566_v28 = vmov 0.0   ;;  %v1568_v29 = vmov 0.0   ;;  %v1570_v30 = vmov 0.0   ;;  %v1572_v31 = vmov 0.0   ;;  %s1578_s26 = smov 0  }
  0x13   :  { %v46_v8 = vld [vmem:[%s1942_s4] sm:$0xff]  ;;  %889 = vmatpush3.msra.mxu0 %v51_v7  ;;  %987 = vmatpush3.msra.mxu1 %v51_v7  ;;  %v1574_v32 = vmov 0.0  }
  0x14   :  { %891 = vmatmul.mubr.msk.f32.vlgmr.msra.gmra.mrb[0].mxu0 %vm52_vm1, %v46_v8  ;;  %900 = vmatmul.mubr.msk.f32.vlgmr.msra.gmra.mrb[0].mxu1 %vm52_vm1, %v49_v9  ;;  %v50_v11 = vld [vmem:[%s1942_s4 + $0x20] sm:$0x1]  ;;  %s1576_s4 = smov 2.56e-08  }
  0x15   :  { %893 = vmatprep.mubr.msk.f32.mxu0 %vm1430_vm0, %v1429_v6  ;;  %902 = vmatprep.mubr.msk.f32.mxu1 %vm1430_vm0, %v1429_v6 }
  0x18   :  { %894 = vmatmul.mubr.msk.f32.gmra.mrb[2].mxu0 %vm52_vm1, %v47_v10  ;;  %903 = vmatmul.mubr.msk.f32.gmra.mrb[2].mxu1 %vm52_vm1, %v50_v11 }
  0x19   :  { %896 = vmatprep.mubr.msk.f32.mxu0 %vm1430_vm0, %v1429_v6 }
  0x1c   :  { %897 = vmatmul.mubr.msk.f32.gmra.mrb[4].mxu0 %vm52_vm1, %v48_v12 }
  0xe7   :  { %v1546_v13 = vpop.f32.mrb[0].mxu0  ;;  %v1548_v14 = vpop.f32.mrb[0].mxu1 }
  0xe8   :  { %v892_v15 = vpop.f32.mrb[1].mxu0  ;;  %v901_v16 = vpop.f32.mrb[1].mxu1 }
  0xeb   :  { %v1550_v17 = vpop.f32.mrb[2].mxu0  ;;  %v1552_v18 = vpop.f32.mrb[2].mxu1 }
  0xec   :  { %v895_v19 = vpop.f32.mrb[3].mxu0  ;;  %v904_v20 = vpop.f32.mrb[3].mxu1 }
  0xef   :  { %v1554_v21 = vpop.f32.mrb[4].mxu0 }
  0xf0   :  { %v898_v22 = vpop.f32.mrb[5].mxu0 }
  0xf1 LB: > { %v1431_v33 = vmov 0.0|0.0   ;;  %v969_v34 = vpack.c.bf16 %v1346_v26, %v1350_v27  ;;  %v972_v35 = vpack.c.bf16 %v1338_v24, %v1342_v25  ;;  %vm1432_vm2 = vmmov 0   ;;  %s380_s27 = sadd.s32 1, %s1378_s26   ;;  %s314_s28 = sld [smem:[#allocation3 + %s1378_s26]]  ;;  %s1378_s26 = sphi %s1578_s26, %s1953_s26   ;;  %s1374_s4 = sphi %s1576_s4, %s1706_s4   ;;  %v1370_v32 = vphi %v1574_v32, %v1952_v32   ;;  %v1366_v31 = vphi %v1572_v31, %v1951_v31   ;;  %v1362_v30 = vphi %v1570_v30, %v1950_v30   ;;  %v1358_v29 = vphi %v1568_v29, %v1949_v29   ;;  %v1354_v28 = vphi %v1566_v28, %v1948_v28   ;;  %v1350_v27 = vphi %v1564_v27, %v326_v27   ;;  %v1346_v26 = vphi %v1562_v26, %v327_v26   ;;  %v1342_v25 = vphi %v1560_v25, %v328_v25   ;;  %v1338_v24 = vphi %v1558_v24, %v329_v24   ;;  %v1334_v23 = vphi %v1556_v23, %v330_v23  }
  0xf2   : > { %968 = vmatprep.subr.bf16.mxu0 %v1431_v33  ;;  %988 = vmatprep.subr.bf16.mxu1 %v1431_v33  ;;  %v1433_v36 = vmov 0.0   ;;  %vm194_vm3 = vcmask 1040384   ;;  %vm178_vm4 = vcmask 269312   ;;  %v288_v38 = vstv %s1938_s0  ;;  %p172_p6 = scmp.lt.s32.totalorder %s380_s27, 100  ;;  %s1953_s26 = smov %s380_s27 }
  0xf3   : > { %970 = vmatpush3.bf16.msra.mxu0 %v969_v34  ;;  %991 = vmatpush3.bf16.msra.mxu1 %v969_v34  ;;  %vm341_vm5 = vcmask 261120   ;;  %vm354_vm6 = vcmask 253952   ;;  %vm358_vm7 = vcmask 7168   ;;  %vm366_vm8 = vcmask 0  }
  0xf4   : > { %971 = vmatprep.subr.bf16.mxu0 %v1431_v33  ;;  %915 = vmatprep.mubr.msk.f32.mxu0 %vm1432_vm2, %v1433_v36 }
  0xf5   : > { %989 = vmatprep.subr.bf16.mxu1 %v1431_v33  ;;  %924 = vmatprep.mubr.msk.f32.mxu1 %vm1432_vm2, %v1433_v36 }
  0xf7   : > { %973 = vmatpush3.bf16.msra.mxu0 %v972_v35  ;;  %992 = vmatpush3.bf16.msra.mxu1 %v972_v35  ;;  %v320_v50 = vstv %s314_s28 }
  0xf8   : > { %913 = vmatprep.subr.mxu0 %v1433_v36  ;;  %990 = vmatprep.subr.mxu1 %v1433_v36 }
  0xfb   : > { %914 = vmatpush3.msk.msra.mxu0 %vm194_vm3, %v1334_v23  ;;  %993 = vmatpush3.msk.msra.mxu1 %vm194_vm3, %v1334_v23 }
  0xfc   : > { %916 = vmatmul.mubr.msk.f32.vlgmr.msra.gmra.mrb[0].mxu0 %vm178_vm4, %v1484_v0  ;;  %925 = vmatmul.mubr.msk.f32.vlgmr.msra.gmra.mrb[0].mxu1 %vm178_vm4, %v1499_v3 }
  0xfd   : > { %918 = vmatprep.mubr.msk.f32.mxu0 %vm1432_vm2, %v1433_v36  ;;  %927 = vmatprep.mubr.msk.f32.mxu1 %vm1432_vm2, %v1433_v36 }
 0x100   : > { %919 = vmatmul.mubr.msk.f32.gmra.mrb[2].mxu0 %vm178_vm4, %v1489_v1  ;;  %928 = vmatmul.mubr.msk.f32.gmra.mrb[2].mxu1 %vm178_vm4, %v1504_v4 }
 0x101   : > { %921 = vmatprep.mubr.msk.f32.mxu0 %vm1432_vm2, %v1433_v36 }
 0x104   : > { %922 = vmatmul.mubr.msk.f32.gmra.mrb[4].mxu0 %vm178_vm4, %v1494_v2 }
 0x1cf   : > { %v264_v37 = vpop.f32.mrb[0].mxu0  ;;  %v279_v39 = vpop.f32.mrb[0].mxu1 }
 0x1d0   : > { %v265_v40 = vadd.f32 %v264_v37, %v1546_v13  ;;  %v917_v41 = vpop.f32.mrb[1].mxu0  ;;  %v280_v42 = vadd.f32 %v279_v39, %v1548_v14  ;;  %v926_v43 = vpop.f32.mrb[1].mxu1 }
 0x1d2   : > { %v289_v44 = vsub.f32 %v265_v40, %v288_v38  ;;  %v299_v45 = vadd.f32 %v288_v38, %v265_v40  ;;  %v292_v46 = vsub.f32 %v280_v42, %v288_v38  ;;  %v302_v47 = vadd.f32 %v288_v38, %v280_v42 }
 0x1d3   : > { %v269_v48 = vpop.f32.mrb[2].mxu0  ;;  %v284_v49 = vpop.f32.mrb[2].mxu1 }
 0x1d4   : > { %v294_v51 = vmax.f32 %v289_v44, 0.0  ;;  %v304_v52 = vmin.f32 %v299_v45, 0.0  ;;  %v270_v53 = vadd.f32 %v269_v48, %v1550_v17  ;;  %v920_v54 = vpop.f32.mrb[3].mxu0  ;;  %v297_v55 = vmax.f32 %v292_v46, 0.0  ;;  %v929_v56 = vpop.f32.mrb[3].mxu1 }
 0x1d5   : > { %v307_v57 = vmin.f32 %v302_v47, 0.0  ;;  %v285_v58 = vadd.f32 %v284_v49, %v1552_v18 }
 0x1d6   : > { %v1632_v59 = vadd.f32 %v304_v52, %v294_v51   ;;  %v290_v60 = vsub.f32 %v270_v53, %v288_v38  ;;  %v300_v61 = vadd.f32 %v288_v38, %v270_v53 }
 0x1d7   : > { %v1634_v62 = vadd.f32 %v307_v57, %v297_v55   ;;  %v274_v63 = vpop.f32.mrb[4].mxu0  ;;  %v293_v7 = vsub.f32 %v285_v58, %v288_v38  ;;  %v303_v8 = vadd.f32 %v288_v38, %v285_v58 }
 0x1d8   : > { %v295_v9 = vmax.f32 %v290_v60, 0.0  ;;  %v305_v10 = vmin.f32 %v300_v61, 0.0  ;;  %v275_v11 = vadd.f32 %v274_v63, %v1554_v21  ;;  %v923_v12 = vpop.f32.mrb[5].mxu0  ;;  %v331_v15 = vsub.f32 %v1370_v32, %v1632_v59 }
 0x1d9   : > { %v298_v16 = vmax.f32 %v293_v7, 0.0  ;;  %v308_v19 = vmin.f32 %v303_v8, 0.0  ;;  %v315_v20 = vsub.f32 %v1632_v59, %v1370_v32  ;;  %v318_v22 = vsub.f32 %v1634_v62, %v1358_v29 }
 0x1da   : > { %v1643_v23 = vadd.f32 %v305_v10, %v295_v9   ;;  %v291_v24 = vsub.f32 %v275_v11, %v288_v38  ;;  %v301_v25 = vadd.f32 %v288_v38, %v275_v11  ;;  %v336_v26 = vmul.f32 %v331_v15, %v331_v15 }
 0x1db   : > { %v1645_v27 = vadd.f32 %v308_v19, %v298_v16   ;;  %v321_v35 = vmul.f32 %v320_v50, %v315_v20  ;;  %v324_v36 = vmul.f32 %v320_v50, %v318_v22  ;;  %v334_v46 = vsub.f32 %v1358_v29, %v1634_v62 }
 0x1dc   : > { %v1946_v33 = vmov %v1643_v23  ;;  %v296_v37 = vmax.f32 %v291_v24, 0.0  ;;  %v306_v39 = vmin.f32 %v301_v25, 0.0  ;;  %v342_v40 = vsel %vm341_vm5, %v336_v26, 0.0 }
 0x1dd   : > { %v1947_v34 = vmov %v1645_v27  ;;  %v332_v41 = vsub.f32 %v1366_v31, %v1946_v33  ;;  %343 = vadd.xlane.f32.xlu0 %v342_v40  ;;  %v326_v27 = vadd.f32 %v321_v35, %v1632_v59   ;;  %v316_v32 = vsub.f32 %v1946_v33, %v1366_v31 }
 0x1de   : > { %v329_v24 = vadd.f32 %v324_v36, %v1634_v62   ;;  %v1654_v38 = vadd.f32 %v306_v39, %v296_v37   ;;  %v319_v43 = vsub.f32 %v1947_v34, %v1354_v28  ;;  %v335_v44 = vsub.f32 %v1354_v28, %v1947_v34 }
 0x1df   : > { %v337_v42 = vmul.f32 %v332_v41, %v332_v41  ;;  %v322_v45 = vmul.f32 %v320_v50, %v316_v32  ;;  %v339_v54 = vmul.f32 %v334_v46, %v334_v46  ;;  %v1952_v32 = vmov %v1632_v59 }
 0x1e0   : > { %v333_v31 = vsub.f32 %v1362_v30, %v1654_v38  ;;  %v317_v48 = vsub.f32 %v1654_v38, %v1362_v30  ;;  %v325_v49 = vmul.f32 %v320_v50, %v319_v43  ;;  %v340_v51 = vmul.f32 %v335_v44, %v335_v44 }
 0x1e1   : > { %v345_v47 = vsel %vm341_vm5, %v337_v42, 0.0  ;;  %v327_v26 = vadd.f32 %v322_v45, %v1946_v33   ;;  %v351_v30 = vsel %vm341_vm5, %v339_v54, 0.0 }
 0x1e2   : > { %346 = vadd.xlane.f32.xlu0 %v345_v47  ;;  %v338_v52 = vmul.f32 %v333_v31, %v333_v31  ;;  %v323_v28 = vmul.f32 %v320_v50, %v317_v48  ;;  %v330_v23 = vadd.f32 %v325_v49, %v1947_v34   ;;  %v355_v29 = vsel %vm354_vm6, %v340_v51, 0.0 }
 0x1e3   : > { %v1951_v31 = vmov %v1946_v33 }
 0x1e4   : > { %v348_v53 = vsel %vm341_vm5, %v338_v52, 0.0  ;;  %v328_v25 = vadd.f32 %v323_v28, %v1654_v38   ;;  %v1948_v28 = vmov %v1947_v34 }
 0x1e5   : > { %349 = vadd.xlane.f32.xlu1 %v348_v53 }
 0x1e6   : > { %356 = vadd.xlane.f32.xlu0 %v355_v29  ;;  %v1949_v29 = vmov %v1634_v62 }
 0x1e9   : > { %352 = vadd.xlane.f32.xlu1 %v351_v30  ;;  %v1950_v30 = vmov %v1654_v38 }
 0x26a   : > { %v344_v55 = vpop.xlane.xlu0 %343 }
 0x26b   : > { %v359_v58 = vsel %vm358_vm7, %v344_v55, 0.0 }
 0x26f   : > { %v347_v56 = vpop.xlane.xlu0 %346 }
 0x270   : > { %v360_v57 = vsel %vm358_vm7, %v347_v56, 0.0 }
 0x271   : > { %v361_v61 = vadd.f32 %v360_v57, %v359_v58 }
 0x272   : > { %v350_v50 = vpop.xlane.xlu1 %349 }
 0x273   : > { %v362_v60 = vsel %vm358_vm7, %v350_v50, 0.0  ;;  %v357_v63 = vpop.xlane.xlu0 %356 }
 0x274   : > { %v363_v7 = vadd.f32 %v362_v60, %v361_v61  ;;  %v367_v10 = vsel %vm366_vm8, %v357_v63, 0.0 }
 0x276   : > { %v353_v8 = vpop.xlane.xlu1 %352 }
 0x277   : > { %v364_v9 = vsel %vm358_vm7, %v353_v8, 0.0 }
 0x278   : > { %v365_v11 = vadd.f32 %v364_v9, %v363_v7 }
 0x27a   : > { %v368_v12 = vadd.f32 %v367_v10, %v365_v11 }
 0x27c   : > { %369 = vadd.xlane.f32.xlu1 %v368_v12 }
 0x309   : > { %v370_v15 = vpop.xlane.xlu1 %369 }
 0x30a   : > { %v371_v16 = vrot.slane %v370_v15, 4 }
 0x30c   : > { %v372_v19 = vadd.f32 %v371_v16, %v370_v15 }
 0x30e   : > { %v373_v20 = vrot.slane %v372_v19, 2 }
 0x310   : > { %v374_v22 = vadd.f32 %v373_v20, %v372_v19 }
 0x312   : > { %v375_v35 = vrot.slane %v374_v22, 1 }
 0x314   : > { %v376_v36 = vadd.f32 %v375_v35, %v374_v22 }
 0x316   : > { %1000 = vpush %v376_v36 }
 0x347   : > { %s1001_s8 = spop %1000 }
 0x348   : > { %p378_p5 = scmp.lt.f32.partialorder %s1001_s8, %s1374_s4  ;;  %s1706_s4 = smov 1.089e-07  }
 0x34a   : > { %s379_s1 = scalar_select %p378_p5, 1, 0 }
 0x34c   : > { %p173_p7 = scmp.eq.s32.totalorder %s379_s1, 0 }
 0x34e   : > { %p174_p8 = pnand %p173_p7, %p172_p6 }
 0x34f   :  { %v381_v37 = vand.u32 (%p174_p8), 2147483647, %v1632_v59  ;;  %v382_v39 = vand.u32 (%p174_p8), 2147483647, %v1946_v33  ;;  %v383_v40 = vand.u32 (%p174_p8), 2147483647, %v1654_v38 }
 0x350   :  { %177 = sbr.rel (!%p174_p8) target bundleno = 241 (0xf1), region = 70  ;;  %v384_v41 = vand.u32 (%p174_p8), 2147483647, %v1634_v62  ;;  %v385_v32 = vand.u32 (%p174_p8), 2147483647, %v1947_v34  ;;  %v1735_v35 = vmov (%p174_p8), 0.0  }
 0x351   :  { %v386_v42 = vadd.f32 (%p174_p8), 0.01, %v381_v37  ;;  %v387_v43 = vadd.f32 (%p174_p8), 0.01, %v382_v39  ;;  %v388_v44 = vadd.f32 (%p174_p8), 0.01, %v383_v40 }
 0x352   :  { %v389_v45 = vadd.f32 (%p174_p8), 0.01, %v384_v41  ;;  %v390_v46 = vadd.f32 (%p174_p8), 0.01, %v385_v32  ;;  %s435_s12 = smul.f32 (%p174_p8), 33.0, %s1938_s0  ;;  %v1737_v36 = vmov (%p174_p8), 0.0  }
 0x353   :  { %1210 = vrcp.f32 (%p174_p8), %v386_v42  ;;  %v1739_v37 = vmov (%p174_p8), 0.0   ;;  %v1741_v39 = vmov (%p174_p8), 0.0   ;;  %v1743_v40 = vmov (%p174_p8), 0.0   ;;  %s1755_s0 = smov (%p174_p8), 2.56e-08   ;;  %s1757_s14 = smov (%p174_p8), 0  }
 0x354   :  { %1212 = vrcp.f32 (%p174_p8), %v387_v43  ;;  %v436_v7 = vstv (%p174_p8), %s435_s12  ;;  %v1745_v41 = vmov (%p174_p8), 0.0   ;;  %v1747_v32 = vmov (%p174_p8), 0.0  }
 0x355   :  { %1214 = vrcp.f32 (%p174_p8), %v388_v44  ;;  %v1749_v42 = vmov (%p174_p8), 0.0   ;;  %v1751_v43 = vmov (%p174_p8), 0.0   ;;  %v1753_v44 = vmov (%p174_p8), 0.0  }
 0x356   :  { %1216 = vrcp.f32 (%p174_p8), %v389_v45 }
 0x357   :  { %1218 = vrcp.f32 %v390_v46 }
 0x35d   :  { %v1211_v23 = vpop.eup %1210 }
 0x35e   :  { %v1213_v59 = vpop.eup %1212  ;;  %v401_v24 = vmul.f32 %v1211_v23, %v1211_v23 }
 0x35f   :  { %v1215_v33 = vpop.eup %1214  ;;  %v402_v25 = vmul.f32 %v1213_v59, %v1213_v59 }
 0x360   :  { %v1217_v26 = vpop.eup %1216  ;;  %v403_v27 = vmul.f32 %v1215_v33, %v1215_v33  ;;  %v407_v62 = vsel %vm341_vm5, %v401_v24, 0.0 }
 0x361   :  { %v1219_v34 = vpop.eup %1218  ;;  %v404_v38 = vmul.f32 %v1217_v26, %v1217_v26  ;;  %v408_v47 = vsel %vm341_vm5, %v402_v25, 0.0 }
 0x362   :  { %v405_v31 = vmul.f32 %v1219_v34, %v1219_v34  ;;  %v409_v48 = vadd.f32 %v408_v47, %v407_v62  ;;  %v410_v49 = vsel %vm341_vm5, %v403_v27, 0.0 }
 0x363   :  { %v412_v51 = vsel %vm341_vm5, %v404_v38, 0.0 }
 0x364   :  { %v411_v52 = vadd.f32 %v410_v49, %v409_v48  ;;  %v415_v28 = vsel %vm354_vm6, %v405_v31, 0.0 }
 0x366   :  { %v413_v29 = vadd.f32 %v412_v51, %v411_v52 }
 0x368   :  { %v416_v53 = vadd.f32 %v415_v28, %v413_v29 }
 0x36a   :  { %417 = vadd.xlane.f32.xlu0 %v416_v53 }
 0x3f7   :  { %v418_v54 = vpop.xlane.xlu0 %417 }
 0x3f8   :  { %v419_v30 = vrot.slane %v418_v54, 4 }
 0x3fa   :  { %v420_v55 = vadd.f32 %v419_v30, %v418_v54 }
 0x3fc   :  { %v421_v56 = vrot.slane %v420_v55, 2 }
 0x3fe   :  { %v422_v57 = vadd.f32 %v421_v56, %v420_v55 }
 0x400   :  { %v423_v50 = vrot.slane %v422_v57, 1 }
 0x402   :  { %v424_v58 = vadd.f32 %v423_v50, %v422_v57 }
 0x404   :  { %1002 = vpush %v424_v58 }
 0x435   :  { %s1003_s9 = spop %1002 }
 0x436   :  { %v426_v60 = vstv %s1003_s9 }
 0x437   :  { %1220 = vrsqrt.f32 %v426_v60 }
 0x441   :  { %v1221_v61 = vpop.eup %1220 }
 0x442   :  { %1004 = vpush %v1221_v61 }
 0x473   :  { %s1005_s13 = spop %1004 }
 0x474   :  { %v429_v63 = vstv %s1005_s13 }
 0x475   :  { %v430_v8 = vmul.f32 %v1211_v23, %v429_v63  ;;  %v431_v9 = vmul.f32 %v1213_v59, %v429_v63  ;;  %v432_v10 = vmul.f32 %v1215_v33, %v429_v63  ;;  %v433_v11 = vmul.f32 %v1217_v26, %v429_v63 }
 0x476   :  { %v434_v12 = vmul.f32 %v1219_v34, %v429_v63 }
 0x477   :  { %v1725_v15 = vmul.f32 %v436_v7, %v430_v8  ;;  %v1727_v16 = vmul.f32 %v436_v7, %v431_v9  ;;  %v1729_v19 = vmul.f32 %v436_v7, %v432_v10  ;;  %v1731_v20 = vmul.f32 %v436_v7, %v433_v11 }
 0x478   :  { %v1733_v22 = vmul.f32 %v436_v7, %v434_v12 }
 0x479 LB: > { %v1434_v45 = vmov 0.0|0.0   ;;  %v975_v46 = vpack.c.bf16 %v1394_v39, %v1398_v40  ;;  %v978_v23 = vpack.c.bf16 %v1386_v36, %v1390_v37  ;;  %vm1435_vm9 = vmmov 0   ;;  %s661_s15 = sadd.s32 1, %s1426_s14   ;;  %s597_s16 = sld [smem:[#allocation3 + %s1426_s14]]  ;;  %s1426_s14 = sphi %s1757_s14, %s1960_s14   ;;  %s1422_s0 = sphi %s1755_s0, %s1892_s0   ;;  %v1418_v44 = vphi %v1753_v44, %v1959_v44   ;;  %v1414_v43 = vphi %v1751_v43, %v1958_v43   ;;  %v1410_v42 = vphi %v1749_v42, %v1957_v42   ;;  %v1406_v32 = vphi %v1747_v32, %v1956_v32   ;;  %v1402_v41 = vphi %v1745_v41, %v1955_v41   ;;  %v1398_v40 = vphi %v1743_v40, %v609_v40   ;;  %v1394_v39 = vphi %v1741_v39, %v610_v39   ;;  %v1390_v37 = vphi %v1739_v37, %v611_v37   ;;  %v1386_v36 = vphi %v1737_v36, %v612_v36   ;;  %v1382_v35 = vphi %v1735_v35, %v613_v35  }
 0x47a   : > { %974 = vmatprep.subr.bf16.mxu0 %v1434_v45  ;;  %994 = vmatprep.subr.bf16.mxu1 %v1434_v45  ;;  %v1436_v59 = vmov 0.0   ;;  %p456_p10 = scmp.lt.s32.totalorder %s661_s15, 100  ;;  %s1960_s14 = smov %s661_s15 }
 0x47b   : > { %976 = vmatpush3.bf16.msra.mxu0 %v975_v46  ;;  %997 = vmatpush3.bf16.msra.mxu1 %v975_v46 }
 0x47c   : > { %977 = vmatprep.subr.bf16.mxu0 %v1434_v45  ;;  %940 = vmatprep.mubr.msk.f32.mxu0 %vm1435_vm9, %v1436_v59 }
 0x47d   : > { %995 = vmatprep.subr.bf16.mxu1 %v1434_v45  ;;  %949 = vmatprep.mubr.msk.f32.mxu1 %vm1435_vm9, %v1436_v59 }
 0x47f   : > { %979 = vmatpush3.bf16.msra.mxu0 %v978_v23  ;;  %998 = vmatpush3.bf16.msra.mxu1 %v978_v23  ;;  %v603_v51 = vstv %s597_s16 }
 0x480   : > { %938 = vmatprep.subr.mxu0 %v1436_v59  ;;  %996 = vmatprep.subr.mxu1 %v1436_v59 }
 0x483   : > { %939 = vmatpush3.msk.msra.mxu0 %vm194_vm3, %v1382_v35  ;;  %999 = vmatpush3.msk.msra.mxu1 %vm194_vm3, %v1382_v35 }
 0x484   : > { %941 = vmatmul.mubr.msk.f32.vlgmr.msra.gmra.mrb[0].mxu0 %vm178_vm4, %v1484_v0  ;;  %950 = vmatmul.mubr.msk.f32.vlgmr.msra.gmra.mrb[0].mxu1 %vm178_vm4, %v1499_v3 }
 0x485   : > { %943 = vmatprep.mubr.msk.f32.mxu0 %vm1435_vm9, %v1436_v59  ;;  %952 = vmatprep.mubr.msk.f32.mxu1 %vm1435_vm9, %v1436_v59 }
 0x488   : > { %944 = vmatmul.mubr.msk.f32.gmra.mrb[2].mxu0 %vm178_vm4, %v1489_v1  ;;  %953 = vmatmul.mubr.msk.f32.gmra.mrb[2].mxu1 %vm178_vm4, %v1504_v4 }
 0x489   : > { %946 = vmatprep.mubr.msk.f32.mxu0 %vm1435_vm9, %v1436_v59 }
 0x48c   : > { %947 = vmatmul.mubr.msk.f32.gmra.mrb[4].mxu0 %vm178_vm4, %v1494_v2 }
 0x557   : > { %v548_v24 = vpop.f32.mrb[0].mxu0  ;;  %v563_v33 = vpop.f32.mrb[0].mxu1 }
 0x558   : > { %v549_v25 = vadd.f32 %v548_v24, %v1546_v13  ;;  %v942_v26 = vpop.f32.mrb[1].mxu0  ;;  %v564_v27 = vadd.f32 %v563_v33, %v1548_v14  ;;  %v951_v62 = vpop.f32.mrb[1].mxu1 }
 0x55a   : > { %v572_v34 = vsub.f32 %v549_v25, %v1725_v15  ;;  %v582_v38 = vadd.f32 %v549_v25, %v1725_v15  ;;  %v575_v47 = vsub.f32 %v564_v27, %v1731_v20  ;;  %v585_v31 = vadd.f32 %v564_v27, %v1731_v20 }
 0x55b   : > { %v553_v48 = vpop.f32.mrb[2].mxu0  ;;  %v568_v49 = vpop.f32.mrb[2].mxu1 }
 0x55c   : > { %v577_v52 = vmax.f32 %v572_v34, 0.0  ;;  %v587_v28 = vmin.f32 %v582_v38, 0.0  ;;  %v554_v29 = vadd.f32 %v553_v48, %v1550_v17  ;;  %v945_v53 = vpop.f32.mrb[3].mxu0  ;;  %v580_v54 = vmax.f32 %v575_v47, 0.0  ;;  %v954_v30 = vpop.f32.mrb[3].mxu1 }
 0x55d   : > { %v590_v55 = vmin.f32 %v585_v31, 0.0  ;;  %v569_v56 = vadd.f32 %v568_v49, %v1552_v18 }
 0x55e   : > { %v1812_v57 = vadd.f32 %v587_v28, %v577_v52   ;;  %v573_v50 = vsub.f32 %v554_v29, %v1727_v16  ;;  %v583_v58 = vadd.f32 %v554_v29, %v1727_v16 }
 0x55f   : > { %v1816_v60 = vadd.f32 %v590_v55, %v580_v54   ;;  %v558_v61 = vpop.f32.mrb[4].mxu0  ;;  %v576_v63 = vsub.f32 %v569_v56, %v1733_v22  ;;  %v586_v7 = vadd.f32 %v569_v56, %v1733_v22 }
 0x560   : > { %v578_v8 = vmax.f32 %v573_v50, 0.0  ;;  %v588_v9 = vmin.f32 %v583_v58, 0.0  ;;  %v559_v10 = vadd.f32 %v558_v61, %v1554_v21  ;;  %v948_v11 = vpop.f32.mrb[5].mxu0  ;;  %v614_v12 = vsub.f32 %v1418_v44, %v1812_v57 }
 0x561   : > { %v581_v35 = vmax.f32 %v576_v63, 0.0  ;;  %v591_v36 = vmin.f32 %v586_v7, 0.0  ;;  %v598_v37 = vsub.f32 %v1812_v57, %v1418_v44  ;;  %v601_v39 = vsub.f32 %v1816_v60, %v1406_v32 }
 0x562   : > { %v1827_v40 = vadd.f32 %v588_v9, %v578_v8   ;;  %v574_v46 = vsub.f32 %v559_v10, %v1729_v19  ;;  %v584_v23 = vadd.f32 %v559_v10, %v1729_v19  ;;  %v619_v59 = vmul.f32 %v614_v12, %v614_v12 }
 0x563   : > { %v1831_v24 = vadd.f32 %v591_v36, %v581_v35   ;;  %v604_v33 = vmul.f32 %v603_v51, %v598_v37  ;;  %v607_v25 = vmul.f32 %v603_v51, %v601_v39  ;;  %v617_v52 = vsub.f32 %v1406_v32, %v1816_v60 }
 0x564   : > { %v1954_v45 = vmov %v1827_v40  ;;  %v579_v26 = vmax.f32 %v574_v46, 0.0  ;;  %v589_v27 = vmin.f32 %v584_v23, 0.0  ;;  %v624_v62 = vsel %vm341_vm5, %v619_v59, 0.0 }
 0x565   : > { %v615_v44 = vsub.f32 %v1414_v43, %v1954_v45  ;;  %625 = vadd.xlane.f32.xlu0 %v624_v62  ;;  %v609_v40 = vadd.f32 %v604_v33, %v1812_v57   ;;  %v599_v34 = vsub.f32 %v1954_v45, %v1414_v43  ;;  %v612_v36 = vadd.f32 %v607_v25, %v1816_v60  }
 0x566   : > { %v1840_v38 = vadd.f32 %v589_v27, %v579_v26   ;;  %v602_v31 = vsub.f32 %v1831_v24, %v1402_v41  ;;  %v618_v48 = vsub.f32 %v1402_v41, %v1831_v24  ;;  %v622_v56 = vmul.f32 %v617_v52, %v617_v52 }
 0x567   : > { %v620_v47 = vmul.f32 %v615_v44, %v615_v44  ;;  %v605_v49 = vmul.f32 %v603_v51, %v599_v34 }
 0x568   : > { %v616_v43 = vsub.f32 %v1410_v42, %v1840_v38  ;;  %v600_v29 = vsub.f32 %v1840_v38, %v1410_v42  ;;  %v608_v53 = vmul.f32 %v603_v51, %v602_v31  ;;  %v623_v54 = vmul.f32 %v618_v48, %v618_v48 }
 0x569   : > { %v627_v28 = vsel %vm341_vm5, %v620_v47, 0.0  ;;  %v610_v39 = vadd.f32 %v605_v49, %v1954_v45   ;;  %v633_v42 = vsel %vm341_vm5, %v622_v56, 0.0 }
 0x56a   : > { %628 = vadd.xlane.f32.xlu0 %v627_v28  ;;  %v621_v30 = vmul.f32 %v616_v43, %v616_v43  ;;  %v606_v55 = vmul.f32 %v603_v51, %v600_v29  ;;  %v613_v35 = vadd.f32 %v608_v53, %v1831_v24   ;;  %v636_v41 = vsel %vm354_vm6, %v623_v54, 0.0 }
 0x56b   : > { %v1958_v43 = vmov %v1954_v45 }
 0x56c   : > { %v630_v32 = vsel %vm341_vm5, %v621_v30, 0.0  ;;  %v611_v37 = vadd.f32 %v606_v55, %v1840_v38  }
 0x56d   : > { %631 = vadd.xlane.f32.xlu1 %v630_v32  ;;  %v1956_v32 = vmov %v1816_v60 }
 0x56e   : > { %637 = vadd.xlane.f32.xlu0 %v636_v41  ;;  %v1955_v41 = vmov %v1831_v24 }
 0x571   : > { %634 = vadd.xlane.f32.xlu1 %v633_v42  ;;  %v1957_v42 = vmov %v1840_v38 }
 0x5f2   : > { %v626_v50 = vpop.xlane.xlu0 %625 }
 0x5f3   : > { %v640_v51 = vsel %vm358_vm7, %v626_v50, 0.0 }
 0x5f7   : > { %v629_v58 = vpop.xlane.xlu0 %628 }
 0x5f8   : > { %v641_v61 = vsel %vm358_vm7, %v629_v58, 0.0 }
 0x5f9   : > { %v642_v8 = vadd.f32 %v641_v61, %v640_v51 }
 0x5fa   : > { %v632_v63 = vpop.xlane.xlu1 %631 }
 0x5fb   : > { %v643_v7 = vsel %vm358_vm7, %v632_v63, 0.0  ;;  %v638_v9 = vpop.xlane.xlu0 %637 }
 0x5fc   : > { %v644_v10 = vadd.f32 %v643_v7, %v642_v8  ;;  %v648_v46 = vsel %vm366_vm8, %v638_v9, 0.0 }
 0x5fe   : > { %v635_v11 = vpop.xlane.xlu1 %634 }
 0x5ff   : > { %v645_v12 = vsel %vm358_vm7, %v635_v11, 0.0 }
 0x600   : > { %v646_v23 = vadd.f32 %v645_v12, %v644_v10 }
 0x602   : > { %v649_v59 = vadd.f32 %v648_v46, %v646_v23 }
 0x604   : > { %650 = vadd.xlane.f32.xlu1 %v649_v59 }
 0x691   : > { %v651_v33 = vpop.xlane.xlu1 %650 }
 0x692   : > { %v652_v25 = vrot.slane %v651_v33, 4 }
 0x694   : > { %v653_v26 = vadd.f32 %v652_v25, %v651_v33 }
 0x696   : > { %v654_v27 = vrot.slane %v653_v26, 2 }
 0x698   : > { %v655_v62 = vadd.f32 %v654_v27, %v653_v26 }
 0x69a   : > { %v656_v44 = vrot.slane %v655_v62, 1 }
 0x69c   : > { %v657_v34 = vadd.f32 %v656_v44, %v655_v62  ;;  %v1959_v44 = vmov %v1812_v57 }
 0x69e   : > { %1006 = vpush %v657_v34 }
 0x6cf   : > { %s1007_s17 = spop %1006 }
 0x6d0   : > { %p659_p9 = scmp.lt.f32.partialorder %s1007_s17, %s1422_s0  ;;  %s1892_s0 = smov 1.089e-07  }
 0x6d2   : > { %s660_s18 = scalar_select %p659_p9, 1, 0 }
 0x6d4   : > { %p457_p11 = scmp.eq.s32.totalorder %s660_s18, 0 }
 0x6d6   : > { %p458_p12 = pnand %p457_p11, %p456_p10 }
 0x6d7   :  { %662 = vst.msk [vmem:[%s1944_s6] sm:$0xff] (%p458_p12), %vm341_vm5, %v1812_v57  ;;  %663 = vst.msk [vmem:[%s1944_s6 + $0x8] sm:$0xff] (%p458_p12), %vm341_vm5, %v1954_v45  ;;  %v981_v0 = vpack.c.bf16 (%p458_p12), %v1954_v45, %v1812_v57  ;;  %965 = vmatprep.mubr.msk.f32.mxu0 (%p458_p12), %vm1430_vm0, %v1429_v6  ;;  %v1437_v1 = vmov (%p458_p12), 0.0|0.0   ;;  %v984_v2 = vpack.c.bf16 (%p458_p12), %v1816_v60, %v1840_v38 }
 0x6d8   :  { %461 = sbr.rel (!%p458_p12) target bundleno = 1145 (0x479), region = 81  ;;  %664 = vst.msk [vmem:[%s1944_s6 + $0x10] sm:$0xff] (%p458_p12), %vm341_vm5, %v1840_v38  ;;  %665 = vst.msk [vmem:[%s1944_s6 + $0x18] sm:$0xff] (%p458_p12), %vm341_vm5, %v1816_v60  ;;  %980 = vmatprep.subr.bf16.mxu0 (%p458_p12), %v1437_v1 }
 0x6d9   :  { %666 = vst.msk [vmem:[%s1944_s6 + $0x20] sm:$0x1] (%p458_p12), %vm354_vm6, %v1831_v24  ;;  %982 = vmatpush3.bf16.msra.mxu0 (%p458_p12), %v981_v0 }
 0x6da   :  { %983 = vmatprep.subr.bf16.mxu0 (%p458_p12), %v1437_v1 }
 0x6dd   :  { %985 = vmatpush3.bf16.msra.mxu0 (%p458_p12), %v984_v2 }
 0x6de   :  { %963 = vmatprep.subr.mxu0 (%p458_p12), %v1429_v6 }
 0x6e1   :  { %964 = vmatpush3.msk.msra.mxu0 %vm194_vm3, %v1831_v24 }
 0x6e2   :  { %966 = vmatmul.mubr.msk.f32.vlgmr.msra.gmra.mrb[0].mxu0 %vm178_vm4, %v1509_v5 }
 0x7b5   :  { %v741_v3 = vpop.f32.mrb[0].mxu0 }
 0x7b6   :  { %745 = vst.msk [vmem:[%s1945_s7] sm:$0xff] %vm341_vm5, %v741_v3  ;;  %v967_v4 = vpop.f32.mrb[1].mxu0 }
 0x7b7   :  { %754 = vsyncpa [#allocation4], 1 }

</bundles_post_ra>
